<compile_context>
chip_gen: v7x
topology: tpu7x:2x2x1
jax: 0.10.0
libtpu: 0.0.40
codegen_flags: <defaults>
</compile_context>

<pallas_src>
import functools

import jax
import jax.numpy as jnp
from jax.experimental import pallas as pl
from jax.experimental.pallas import tpu as pltpu

_LANES = 128
_MIB = 1 << 20


def _round_up(v, m):
    return (v + m - 1) // m * m


def _pad2(arr, rows, cols):
    r, c = arr.shape
    return jnp.pad(arr, ((0, rows - r), (0, cols - c)))


def _tpu_generation():
    try:
        kind = jax.devices()[0].device_kind.lower()
    except Exception:
        return "unknown"
    if "v6" in kind:
        return "v6e"
    if "7" in kind:
        return "v7x"
    if "v5" in kind:
        return "v5e"
    return "unknown"


def _derive_tiles(n, gen):
    """Row tile sized to the MXU (256 on v6e/v7x, 128 on v5e); neighbor
    (reduction) tile = largest of {512, 256, 128} dividing the padded node
    count, so per-step VMEM is bounded independent of N."""
    n128 = _round_up(max(n, 1), _LANES)
    row_tile = 256 if gen in ("v6e", "v7x") else 128
    row_tile = min(row_tile, n128)
    n_pad = _round_up(n, row_tile)
    k_tile = next(c for c in (512, 256, 128) if n_pad % c == 0)
    return row_tile, k_tile, n_pad


# ---------------------------------------------------------------------------
# Tiled (large-graph) path: one SAGEConv layer per pallas_call.
# ---------------------------------------------------------------------------
def _sage_tiled_kernel(a_ref, x_ref, xr_ref, dinv_ref, wl_ref, wr_ref, b_ref,
                       o_ref, acc_ref, *, apply_relu):
    """grid = (row_tiles, neighbor_tiles).  The neighbor axis accumulates the
    aggregation matmul into an f32 VMEM scratch; the linear + normalize
    epilogue runs on the last neighbor step only."""
    k = pl.program_id(1)

    @pl.when(k == 0)
    def _():
        acc_ref[...] = jnp.zeros_like(acc_ref)

    # Streaming neighbor aggregation: [tm, tk] @ [tk, Fin] (bf16 in, f32 acc).
    acc_ref[...] += jnp.dot(a_ref[...], x_ref[...],
                            preferred_element_type=jnp.float32)

    @pl.when(k == pl.num_programs(1) - 1)
    def _():
        # Mean: exact bf16 edge counts were accumulated; apply 1/deg in f32.
        agg = acc_ref[...] * dinv_ref[...]
        # lin_l(agg) + lin_r(x_root) + b: two MXU dots summed in f32
        # (no lane-axis concatenate -> no [tm, 2*Fin] bf16 copy).
        out = (
            jnp.dot(agg.astype(jnp.bfloat16), wl_ref[...],
                    preferred_element_type=jnp.float32)
            + jnp.dot(xr_ref[...], wr_ref[...],
                      preferred_element_type=jnp.float32)
            + b_ref[...]
        )
        # F.normalize: out / max(||out||, 1e-12), one EUP rsqrt.
        sumsq = jnp.sum(out * out, axis=-1, keepdims=True)
        out = out * jax.lax.rsqrt(jnp.maximum(sumsq, 1e-24))
        if apply_relu:
            out = jnp.maximum(out, 0.0)
        o_ref[...] = out.astype(o_ref.dtype)


def sage_conv_tiled(a_p, dinv_p, x_p, w_l, b_l, w_r, *, apply_relu, out_dtype,
                    row_tile, k_tile):
    """One SAGEConv(normalize=True) layer over pre-padded operands.

    a_p:    [Np, Np]   bf16 edge counts (zero padded)
    dinv_p: [Np, 1]    f32  1 / max(deg_in, 1)
    x_p:    [Np, Fip]  bf16 node features (zero padded)
    Returns the padded [Np, Fop] output (caller slices real rows/cols).
    """
    n_pad, fp_in = x_p.shape
    f_out = w_l.shape[1]
    fp_out = _round_up(f_out, _LANES)

    wl = _pad2(w_l, fp_in, fp_out).astype(jnp.bfloat16)
    wr = _pad2(w_r, fp_in, fp_out).astype(jnp.bfloat16)
    b = _pad2(b_l, 1, fp_out).astype(jnp.float32)

    grid = (n_pad // row_tile, n_pad // k_tile)

    # Double-buffered tiles + f32 accumulator: independent of N.
    est = (2 * row_tile * k_tile * 2      # A tiles
           + 2 * k_tile * fp_in * 2       # x tiles
           + 2 * row_tile * fp_in * 2     # root-branch rows
           + 2 * row_tile * 4             # deg_inv
           + 2 * 2 * fp_in * fp_out * 2   # W_l, W_r
           + 2 * fp_out * 4               # bias
           + 2 * row_tile * fp_out * 4    # output tile
           + row_tile * fp_in * 4)        # accumulator scratch
    vmem_limit = int(min(max(4 * est, 24 * _MIB), 56 * _MIB))

    kernel = functools.partial(_sage_tiled_kernel, apply_relu=apply_relu)
    return pl.pallas_call(
        kernel,
        out_shape=jax.ShapeDtypeStruct((n_pad, fp_out), out_dtype),
        grid=grid,
        in_specs=[
            pl.BlockSpec((row_tile, k_tile), lambda i, k: (i, k)),   # A (streamed)
            pl.BlockSpec((k_tile, fp_in), lambda i, k: (k, 0)),      # x (streamed)
            pl.BlockSpec((row_tile, fp_in), lambda i, k: (i, 0)),    # root rows
            pl.BlockSpec((row_tile, 1), lambda i, k: (i, 0)),        # 1/deg
            pl.BlockSpec((fp_in, fp_out), lambda i, k: (0, 0)),      # W_l
            pl.BlockSpec((fp_in, fp_out), lambda i, k: (0, 0)),      # W_r
            pl.BlockSpec((1, fp_out), lambda i, k: (0, 0)),          # bias
        ],
        out_specs=pl.BlockSpec((row_tile, fp_out), lambda i, k: (i, 0)),
        scratch_shapes=[pltpu.VMEM((row_tile, fp_in), jnp.float32)],
        compiler_params=pltpu.CompilerParams(
            dimension_semantics=("parallel", "arbitrary"),
            vmem_limit_bytes=vmem_limit,
        ),
    )(a_p, x_p, x_p, dinv_p, wl, wr, b)


# ---------------------------------------------------------------------------
# Fused (small-graph) path: both layers in a single grid=(1,) pallas_call.
# ---------------------------------------------------------------------------
def _fused_two_layer_kernel(a_ref, dinv_ref, x_ref, wl1_ref, wr1_ref, b1_ref,
                            wl2_ref, wr2_ref, b2_ref, o_ref, *, n_valid):
    a = a_ref[...]            # [Np, Np]  bf16 edge counts
    dinv = dinv_ref[...]      # [Np, 1]   f32
    x = x_ref[...]            # [Np, F1p] bf16

    def conv(feats_bf16, wl_ref, wr_ref, b_ref):
        agg = jnp.dot(a, feats_bf16, preferred_element_type=jnp.float32) * dinv
        out = (jnp.dot(agg.astype(jnp.bfloat16), wl_ref[...],
                       preferred_element_type=jnp.float32)
               + jnp.dot(feats_bf16, wr_ref[...],
                         preferred_element_type=jnp.float32)
               + b_ref[...])
        sumsq = jnp.sum(out * out, axis=-1, keepdims=True)
        return out * jax.lax.rsqrt(jnp.maximum(sumsq, 1e-24))

    h = jnp.maximum(conv(x, wl1_ref, wr1_ref, b1_ref), 0.0)        # layer 1 + ReLU
    # Padded rows of h are normalize(bias) garbage; A's padded columns are
    # zero so they cannot reach real rows -- zero them anyway for robustness.
    row_ids = jax.lax.broadcasted_iota(jnp.int32, h.shape, 0)
    h = jnp.where(row_ids < n_valid, h, 0.0).astype(jnp.bfloat16)
    out = conv(h, wl2_ref, wr2_ref, b2_ref)                        # layer 2
    o_ref[...] = out.astype(o_ref.dtype)


def graphsage_fused(counts, deg_inv, x, params):
    n, f_in = x.shape
    h_feats = params["w_l1"].shape[1]
    out_feats = params["w_l2"].shape[1]
    n_pad = _round_up(n, 16)                       # bf16 sublane packing
    f1 = _round_up(f_in, _LANES)
    f2 = _round_up(h_feats, _LANES)
    f3 = _round_up(out_feats, _LANES)

    a_p = _pad2(counts, n_pad, n_pad).astype(jnp.bfloat16)
    dinv_p = _pad2(deg_inv, n_pad, 1).astype(jnp.float32)
    x_p = _pad2(x, n_pad, f1).astype(jnp.bfloat16)
    wl1 = _pad2(params["w_l1"], f1, f2).astype(jnp.bfloat16)
    wr1 = _pad2(params["w_r1"], f1, f2).astype(jnp.bfloat16)
    b1 = _pad2(params["b_l1"], 1, f2).astype(jnp.float32)
    wl2 = _pad2(params["w_l2"], f2, f3).astype(jnp.bfloat16)
    wr2 = _pad2(params["w_r2"], f2, f3).astype(jnp.bfloat16)
    b2 = _pad2(params["b_l2"], 1, f3).astype(jnp.float32)

    est = (n_pad * n_pad * 2 + n_pad * 4 + n_pad * f1 * 2
           + 2 * f1 * f2 * 2 + f2 * 4 + 2 * f2 * f3 * 2 + f3 * 4
           + n_pad * f3 * 4
           + 2 * n_pad * (f1 + f2) * 4)            # intermediate headroom
    vmem_limit = int(min(max(2 * est, 24 * _MIB), 56 * _MIB))

    full = lambda i: (0, 0)
    out = pl.pallas_call(
        functools.partial(_fused_two_layer_kernel, n_valid=n),
        out_shape=jax.ShapeDtypeStruct((n_pad, f3), jnp.float32),
        grid=(1,),
        in_specs=[
            pl.BlockSpec((n_pad, n_pad), full),    # A (edge counts)
            pl.BlockSpec((n_pad, 1), full),        # 1/deg
            pl.BlockSpec((n_pad, f1), full),       # x
            pl.BlockSpec((f1, f2), full),          # W_l1
            pl.BlockSpec((f1, f2), full),          # W_r1
            pl.BlockSpec((1, f2), full),           # b1
            pl.BlockSpec((f2, f3), full),          # W_l2
            pl.BlockSpec((f2, f3), full),          # W_r2
            pl.BlockSpec((1, f3), full),           # b2
        ],
        out_specs=pl.BlockSpec((n_pad, f3), full),
        compiler_params=pltpu.CompilerParams(
            dimension_semantics=("arbitrary",),
            vmem_limit_bytes=vmem_limit,
        ),
    )(a_p, dinv_p, x_p, wl1, wr1, b1, wl2, wr2, b2)
    return out[:n, :out_feats]


# ---------------------------------------------------------------------------
# Forward wrapper
# ---------------------------------------------------------------------------
def build_graph_operators(edge_index, num_nodes):
    """edge_index: [2, E] int32, row 0 = source, row 1 = target (PyG).
    counts[i, j] = multiplicity(j -> i) (exact in bf16 for small counts);
    deg_inv[i] = 1 / max(deg_in(i), 1), matching PyG scatter-mean."""
    src, dst = edge_index[0], edge_index[1]
    counts = jnp.zeros((num_nodes, num_nodes), jnp.float32).at[dst, src].add(1.0)
    deg = jnp.sum(counts, axis=1, keepdims=True)
    return counts, 1.0 / jnp.maximum(deg, 1.0)


def graphsage_forward(x, edge_index, params, *, allow_fused=True):
    """GraphSAGE.forward in eval mode (F.dropout(p=0.6) is identity)."""
    n, f_in = x.shape
    counts, deg_inv = build_graph_operators(edge_index, n)

    if allow_fused and _round_up(n, 16) <= 1024:
        # Small graphs are launch/DMA-latency bound: fuse both layers.
        return graphsage_fused(counts, deg_inv, x, params)

    gen = _tpu_generation()
    row_tile, k_tile, n_pad = _derive_tiles(n, gen)
    f1 = _round_up(f_in, _LANES)
    out_feats = params["w_l2"].shape[1]

    # Pad + cast the O(N^2) adjacency ONCE and reuse it for both layers.
    a_p = _pad2(counts, n_pad, n_pad).astype(jnp.bfloat16)
    dinv_p = _pad2(deg_inv, n_pad, 1).astype(jnp.float32)
    x_p = _pad2(x, n_pad, f1).astype(jnp.bfloat16)

    h_p = sage_conv_tiled(
        a_p, dinv_p, x_p, params["w_l1"], params["b_l1"], params["w_r1"],
        apply_relu=True, out_dtype=jnp.bfloat16,     # fed straight to layer 2
        row_tile=row_tile, k_tile=k_tile)
    out_p = sage_conv_tiled(
        a_p, dinv_p, h_p, params["w_l2"], params["b_l2"], params["w_r2"],
        apply_relu=False, out_dtype=jnp.float32,
        row_tile=row_tile, k_tile=k_tile)
    return out_p[:n, :out_feats]


def reference_forward(x, edge_index, params):
    """Pure-JAX f32 reference (PyG SAGEConv normalize=True semantics)."""
    n = x.shape[0]
    src, dst = edge_index[0], edge_index[1]
    a = jnp.zeros((n, n), jnp.float32).at[dst, src].add(1.0)
    a = a / jnp.maximum(jnp.sum(a, axis=1, keepdims=True), 1.0)

    def conv(feats, wl, b, wr):
        out = (a @ feats) @ wl + b + feats @ wr
        norm = jnp.sqrt(jnp.sum(out * out, axis=-1, keepdims=True))
        return out / jnp.maximum(norm, 1e-12)

    h = jax.nn.relu(conv(x, params["w_l1"], params["b_l1"], params["w_r1"]))
    return conv(h, params["w_l2"], params["b_l2"], params["w_r2"])


def init_params(key, in_feats, h_feats, out_feats):
    ks = jax.random.split(key, 6)

    def lin(k, fin, fout):
        bound = 1.0 / (fin ** 0.5)
        return jax.random.uniform(k, (fin, fout), jnp.float32, -bound, bound)

    def bias(k, fin, fout):
        bound = 1.0 / (fin ** 0.5)
        return jax.random.uniform(k, (1, fout), jnp.float32, -bound, bound)

    return {
        "w_l1": lin(ks[0], in_feats, h_feats),
        "b_l1": bias(ks[1], in_feats, h_feats),
        "w_r1": lin(ks[2], in_feats, h_feats),
        "w_l2": lin(ks[3], h_feats, out_feats),
        "b_l2": bias(ks[4], h_feats, out_feats),
        "w_r2": lin(ks[5], h_feats, out_feats),
    }


if __name__ == "__main__":
    key = jax.random.PRNGKey(0)
    k1, k2 = jax.random.split(key)

    def make_case(k, num_nodes, num_edges, in_feats, h_feats, out_feats):
        kx, ke, kp = jax.random.split(k, 3)
        x = jax.random.normal(kx, (num_nodes, in_feats), jnp.float32)
        ei = jax.random.randint(ke, (2, num_edges), 0, num_nodes, jnp.int32)
        params = init_params(kp, in_feats, h_feats, out_feats)
        return x, ei, params

    # Case 1: tiny graph -> fused single-launch kernel (the demo regime).
    x1, ei1, p1 = make_case(k1, 64, 256, 16, 32, 8)
    out1 = jax.jit(graphsage_forward)(x1, ei1, p1)
    jax.block_until_ready(out1)
    assert out1.shape == (64, 8)
    assert bool(jnp.all(jnp.isfinite(out1)))
    err1 = float(jnp.max(jnp.abs(out1 - reference_forward(x1, ei1, p1))))
    assert err1 < 5e-2, f"fused path mismatch: {err1}"

    # Case 2: larger graph -> row/neighbor-tiled streaming path.
    x2, ei2, p2 = make_case(k2, 640, 2560, 48, 64, 12)
    tiled_fwd = jax.jit(functools.partial(graphsage_forward, allow_fused=False))
    out2 = tiled_fwd(x2, ei2, p2)
    jax.block_until_ready(out2)
    assert out2.shape == (640, 12)
    assert bool(jnp.all(jnp.isfinite(out2)))
    err2 = float(jnp.max(jnp.abs(out2 - reference_forward(x2, ei2, p2))))
    assert err2 < 5e-2, f"tiled path mismatch: {err2}"

    print("KERNEL_OK")
</pallas_src>

<mosaic_0001>
module attributes {stable_mosaic.version = 11 : i64} {
  func.func private @main(%arg0: i32) attributes {dimension_semantics = [#tpu.dimension_semantics<core_parallel>], iteration_bounds = array<i64: 2>, tpu.core_type = #tpu.core_type<sc_scalar_subcore>, window_params = []} {
    return
  }
}

module attributes {stable_mosaic.version = 11 : i64} {
  func.func private @main(%arg0: i32) attributes {dimension_semantics = [#tpu.dimension_semantics<core_parallel>], iteration_bounds = array<i64: 2>, tpu.core_type = #tpu.core_type<sc_scalar_subcore>, window_params = []} {
    return
  }
}

module attributes {stable_mosaic.version = 11 : i64} {
  func.func @_fused_two_layer_kernel(%arg0: i32, %arg1: memref<64x64xbf16, #tpu.memory_space<vmem>>, %arg2: memref<64x1xf32, #tpu.memory_space<vmem>>, %arg3: memref<64x128xbf16, #tpu.memory_space<vmem>>, %arg4: memref<128x128xbf16, #tpu.memory_space<vmem>>, %arg5: memref<128x128xbf16, #tpu.memory_space<vmem>>, %arg6: memref<1x128xf32, #tpu.memory_space<vmem>>, %arg7: memref<128x128xbf16, #tpu.memory_space<vmem>>, %arg8: memref<128x128xbf16, #tpu.memory_space<vmem>>, %arg9: memref<1x128xf32, #tpu.memory_space<vmem>>, %arg10: memref<64x128xf32, #tpu.memory_space<vmem>>) attributes {dimension_semantics = [#tpu.dimension_semantics<arbitrary>], iteration_bounds = array<i64: 1>, scalar_prefetch = 0 : i64, scratch_operands = 0 : i64, tpu.core_type = #tpu.core_type<tc>, window_params = [{pipeline_mode = #tpu.pipeline_mode<synchronous>, transform_indices = @transform_0, window_bounds = array<i64: 64, 64>}, {pipeline_mode = #tpu.pipeline_mode<synchronous>, transform_indices = @transform_1, window_bounds = array<i64: 64, 1>}, {pipeline_mode = #tpu.pipeline_mode<synchronous>, transform_indices = @transform_2, window_bounds = array<i64: 64, 128>}, {pipeline_mode = #tpu.pipeline_mode<synchronous>, transform_indices = @transform_3, window_bounds = array<i64: 128, 128>}, {pipeline_mode = #tpu.pipeline_mode<synchronous>, transform_indices = @transform_4, window_bounds = array<i64: 128, 128>}, {pipeline_mode = #tpu.pipeline_mode<synchronous>, transform_indices = @transform_5, window_bounds = array<i64: 1, 128>}, {pipeline_mode = #tpu.pipeline_mode<synchronous>, transform_indices = @transform_6, window_bounds = array<i64: 128, 128>}, {pipeline_mode = #tpu.pipeline_mode<synchronous>, transform_indices = @transform_7, window_bounds = array<i64: 128, 128>}, {pipeline_mode = #tpu.pipeline_mode<synchronous>, transform_indices = @transform_8, window_bounds = array<i64: 1, 128>}, {pipeline_mode = #tpu.pipeline_mode<synchronous>, transform_indices = @transform_9, window_bounds = array<i64: 64, 128>}]} {
    %c0 = arith.constant 0 : index
    %c0_0 = arith.constant 0 : index
    %0 = vector.load %arg1[%c0, %c0_0] : memref<64x64xbf16, #tpu.memory_space<vmem>>, vector<64x64xbf16>
    %c0_1 = arith.constant 0 : index
    %c0_2 = arith.constant 0 : index
    %1 = vector.load %arg2[%c0_1, %c0_2] : memref<64x1xf32, #tpu.memory_space<vmem>>, vector<64x1xf32>
    %c0_3 = arith.constant 0 : index
    %c0_4 = arith.constant 0 : index
    %2 = vector.load %arg3[%c0_3, %c0_4] : memref<64x128xbf16, #tpu.memory_space<vmem>>, vector<64x128xbf16>
    %cst = arith.constant dense<0.000000e+00> : vector<64x128xf32>
    %3 = tpu.matmul %0, %2, %cst {dimension_numbers = #tpu.dot_dimension_numbers<[1], [0], [0], [1], [0, 0, 1, 1], [], []>} : vector<64x64xbf16>, vector<64x128xbf16>, vector<64x128xf32> -> vector<64x128xf32>
    %4 = vector.broadcast %1 : vector<64x1xf32> to vector<64x128xf32>
    %5 = arith.mulf %3, %4 : vector<64x128xf32>
    %6 = arith.truncf %5 : vector<64x128xf32> to vector<64x128xbf16>
    %c0_5 = arith.constant 0 : index
    %c0_6 = arith.constant 0 : index
    %7 = vector.load %arg4[%c0_5, %c0_6] : memref<128x128xbf16, #tpu.memory_space<vmem>>, vector<128x128xbf16>
    %cst_7 = arith.constant dense<0.000000e+00> : vector<64x128xf32>
    %8 = tpu.matmul %6, %7, %cst_7 {dimension_numbers = #tpu.dot_dimension_numbers<[1], [0], [0], [1], [0, 0, 1, 1], [], []>} : vector<64x128xbf16>, vector<128x128xbf16>, vector<64x128xf32> -> vector<64x128xf32>
    %c0_8 = arith.constant 0 : index
    %c0_9 = arith.constant 0 : index
    %9 = vector.load %arg5[%c0_8, %c0_9] : memref<128x128xbf16, #tpu.memory_space<vmem>>, vector<128x128xbf16>
    %cst_10 = arith.constant dense<0.000000e+00> : vector<64x128xf32>
    %10 = tpu.matmul %2, %9, %cst_10 {dimension_numbers = #tpu.dot_dimension_numbers<[1], [0], [0], [1], [0, 0, 1, 1], [], []>} : vector<64x128xbf16>, vector<128x128xbf16>, vector<64x128xf32> -> vector<64x128xf32>
    %11 = arith.addf %8, %10 : vector<64x128xf32>
    %c0_11 = arith.constant 0 : index
    %c0_12 = arith.constant 0 : index
    %12 = vector.load %arg6[%c0_11, %c0_12] : memref<1x128xf32, #tpu.memory_space<vmem>>, vector<1x128xf32>
    %13 = vector.broadcast %12 : vector<1x128xf32> to vector<64x128xf32>
    %14 = arith.addf %11, %13 : vector<64x128xf32>
    %15 = arith.mulf %14, %14 : vector<64x128xf32>
    %cst_13 = arith.constant dense<0.000000e+00> : vector<64xf32>
    %16 = vector.multi_reduction <add>, %15, %cst_13 [1] : vector<64x128xf32> to vector<64xf32>
    %17 = vector.shape_cast %16 : vector<64xf32> to vector<64x1xf32>
    %cst_14 = arith.constant 1.000000e-24 : f32
    %18 = vector.broadcast %cst_14 : f32 to vector<64x1xf32>
    %19 = arith.maximumf %17, %18 : vector<64x1xf32>
    %20 = math.rsqrt %19 : vector<64x1xf32>
    %21 = vector.broadcast %20 : vector<64x1xf32> to vector<64x128xf32>
    %22 = arith.mulf %14, %21 : vector<64x128xf32>
    %cst_15 = arith.constant 0.000000e+00 : f32
    %23 = vector.broadcast %cst_15 : f32 to vector<64x128xf32>
    %24 = arith.maximumf %22, %23 : vector<64x128xf32>
    %25 = tpu.iota {dimensions = array<i32: 0>} : vector<64x128xi32>
    %c64_i32 = arith.constant 64 : i32
    %26 = vector.broadcast %c64_i32 : i32 to vector<64x128xi32>
    %27 = arith.cmpi slt, %25, %26 : vector<64x128xi32>
    %cst_16 = arith.constant 0.000000e+00 : f32
    %28 = vector.broadcast %cst_16 : f32 to vector<64x128xf32>
    %29 = arith.select %27, %24, %28 : vector<64x128xi1>, vector<64x128xf32>
    %30 = arith.truncf %29 : vector<64x128xf32> to vector<64x128xbf16>
    %cst_17 = arith.constant dense<0.000000e+00> : vector<64x128xf32>
    %31 = tpu.matmul %0, %30, %cst_17 {dimension_numbers = #tpu.dot_dimension_numbers<[1], [0], [0], [1], [0, 0, 1, 1], [], []>} : vector<64x64xbf16>, vector<64x128xbf16>, vector<64x128xf32> -> vector<64x128xf32>
    %32 = vector.broadcast %1 : vector<64x1xf32> to vector<64x128xf32>
    %33 = arith.mulf %31, %32 : vector<64x128xf32>
    %34 = arith.truncf %33 : vector<64x128xf32> to vector<64x128xbf16>
    %c0_18 = arith.constant 0 : index
    %c0_19 = arith.constant 0 : index
    %35 = vector.load %arg7[%c0_18, %c0_19] : memref<128x128xbf16, #tpu.memory_space<vmem>>, vector<128x128xbf16>
    %cst_20 = arith.constant dense<0.000000e+00> : vector<64x128xf32>
    %36 = tpu.matmul %34, %35, %cst_20 {dimension_numbers = #tpu.dot_dimension_numbers<[1], [0], [0], [1], [0, 0, 1, 1], [], []>} : vector<64x128xbf16>, vector<128x128xbf16>, vector<64x128xf32> -> vector<64x128xf32>
    %c0_21 = arith.constant 0 : index
    %c0_22 = arith.constant 0 : index
    %37 = vector.load %arg8[%c0_21, %c0_22] : memref<128x128xbf16, #tpu.memory_space<vmem>>, vector<128x128xbf16>
    %cst_23 = arith.constant dense<0.000000e+00> : vector<64x128xf32>
    %38 = tpu.matmul %30, %37, %cst_23 {dimension_numbers = #tpu.dot_dimension_numbers<[1], [0], [0], [1], [0, 0, 1, 1], [], []>} : vector<64x128xbf16>, vector<128x128xbf16>, vector<64x128xf32> -> vector<64x128xf32>
    %39 = arith.addf %36, %38 : vector<64x128xf32>
    %c0_24 = arith.constant 0 : index
    %c0_25 = arith.constant 0 : index
    %40 = vector.load %arg9[%c0_24, %c0_25] : memref<1x128xf32, #tpu.memory_space<vmem>>, vector<1x128xf32>
    %41 = vector.broadcast %40 : vector<1x128xf32> to vector<64x128xf32>
    %42 = arith.addf %39, %41 : vector<64x128xf32>
    %43 = arith.mulf %42, %42 : vector<64x128xf32>
    %cst_26 = arith.constant dense<0.000000e+00> : vector<64xf32>
    %44 = vector.multi_reduction <add>, %43, %cst_26 [1] : vector<64x128xf32> to vector<64xf32>
    %45 = vector.shape_cast %44 : vector<64xf32> to vector<64x1xf32>
    %cst_27 = arith.constant 1.000000e-24 : f32
    %46 = vector.broadcast %cst_27 : f32 to vector<64x1xf32>
    %47 = arith.maximumf %45, %46 : vector<64x1xf32>
    %48 = math.rsqrt %47 : vector<64x1xf32>
    %49 = vector.broadcast %48 : vector<64x1xf32> to vector<64x128xf32>
    %50 = arith.mulf %42, %49 : vector<64x128xf32>
    %c0_28 = arith.constant 0 : index
    %c0_29 = arith.constant 0 : index
    %51 = vector.load %arg10[%c0_28, %c0_29] : memref<64x128xf32, #tpu.memory_space<vmem>>, vector<64x128xf32>
    tpu.vector_store %arg10[%c0_28, %c0_29], %50 {strides = array<i32>} : memref<64x128xf32, #tpu.memory_space<vmem>>, vector<64x128xf32>,
    return
  }
  func.func @transform_0(%arg0: i32) -> (i32, i32) {
    %c0_i32 = arith.constant 0 : i32
    %c0_i32_0 = arith.constant 0 : i32
    %c0_i32_1 = arith.constant 0 : i32
    return %c0_i32, %c0_i32_0 : i32, i32
  }
  func.func @transform_1(%arg0: i32) -> (i32, i32) {
    %c0_i32 = arith.constant 0 : i32
    %c0_i32_0 = arith.constant 0 : i32
    %c0_i32_1 = arith.constant 0 : i32
    return %c0_i32, %c0_i32_0 : i32, i32
  }
  func.func @transform_2(%arg0: i32) -> (i32, i32) {
    %c0_i32 = arith.constant 0 : i32
    %c0_i32_0 = arith.constant 0 : i32
    %c0_i32_1 = arith.constant 0 : i32
    return %c0_i32, %c0_i32_0 : i32, i32
  }
  func.func @transform_3(%arg0: i32) -> (i32, i32) {
    %c0_i32 = arith.constant 0 : i32
    %c0_i32_0 = arith.constant 0 : i32
    %c0_i32_1 = arith.constant 0 : i32
    return %c0_i32, %c0_i32_0 : i32, i32
  }
  func.func @transform_4(%arg0: i32) -> (i32, i32) {
    %c0_i32 = arith.constant 0 : i32
    %c0_i32_0 = arith.constant 0 : i32
    %c0_i32_1 = arith.constant 0 : i32
    return %c0_i32, %c0_i32_0 : i32, i32
  }
  func.func @transform_5(%arg0: i32) -> (i32, i32) {
    %c0_i32 = arith.constant 0 : i32
    %c0_i32_0 = arith.constant 0 : i32
    %c0_i32_1 = arith.constant 0 : i32
    return %c0_i32, %c0_i32_0 : i32, i32
  }
  func.func @transform_6(%arg0: i32) -> (i32, i32) {
    %c0_i32 = arith.constant 0 : i32
    %c0_i32_0 = arith.constant 0 : i32
    %c0_i32_1 = arith.constant 0 : i32
    return %c0_i32, %c0_i32_0 : i32, i32
  }
  func.func @transform_7(%arg0: i32) -> (i32, i32) {
    %c0_i32 = arith.constant 0 : i32
    %c0_i32_0 = arith.constant 0 : i32
    %c0_i32_1 = arith.constant 0 : i32
    return %c0_i32, %c0_i32_0 : i32, i32
  }
  func.func @transform_8(%arg0: i32) -> (i32, i32) {
    %c0_i32 = arith.constant 0 : i32
    %c0_i32_0 = arith.constant 0 : i32
    %c0_i32_1 = arith.constant 0 : i32
    return %c0_i32, %c0_i32_0 : i32, i32
  }
  func.func @transform_9(%arg0: i32) -> (i32, i32) {
    %c0_i32 = arith.constant 0 : i32
    %c0_i32_0 = arith.constant 0 : i32
    %c0_i32_1 = arith.constant 0 : i32
    return %c0_i32, %c0_i32_0 : i32, i32
  }
}

</mosaic_0001>

<bundles_post_ra>
// kernel: graphsage_forward.1
= control target key start
LH: loop header
LB: loop body
LE: loop exit
PB: predicated region body
PF: predicated region fallthrough
CT: control target
= control target key end

     0   :  { %v1332_v1 = vmov 0   ;;  %vm101_vm0 = vcmask 523264   ;;  %s1624_s2 = inlined_call_operand.vmem [shape: bf16[64,128], index: 2, kind: input, shape index: {}]   ;;  %s1625_s0 = inlined_call_operand.vmem [shape: bf16[64,64], index: 0, kind: input, shape index: {}]   ;;  %s1626_s1 = inlined_call_operand.vmem [shape: f32[64,1], index: 1, kind: input, shape index: {}]   ;;  %s1627_s4 = inlined_call_operand.vmem [shape: bf16[128,128], index: 4, kind: input, shape index: {}]   ;;  %s1628_s3 = inlined_call_operand.vmem [shape: bf16[128,128], index: 3, kind: input, shape index: {}]   ;;  %s1629_s5 = inlined_call_operand.vmem [shape: f32[1,128], index: 5, kind: input, shape index: {}]   ;;  %s1630_s7 = inlined_call_operand.vmem [shape: bf16[128,128], index: 7, kind: input, shape index: {}]   ;;  %s1631_s6 = inlined_call_operand.vmem [shape: bf16[128,128], index: 6, kind: input, shape index: {}]   ;;  %s1632_s8 = inlined_call_operand.vmem [shape: f32[1,128], index: 8, kind: input, shape index: {}]   ;;  %s1633_s9 = inlined_call_operand.vmem [shape: f32[64,128], index: 9, kind: output, shape index: {}]  }
   0x1   :  { %v1260_v0 = vld [vmem:[%s1624_s2] sm:$0xff]   ;;  %1258 = vset.pattern.permute.xlu0 %v1332_v1  ;;  %1259 = vset.pattern.permute.xlu1 %v1332_v1  ;;  %v1389_v2 = vld [vmem:[%s1624_s2 + $0x8] sm:$0xff]   ;;  %v1394_v3 = vld [vmem:[%s1624_s2 + $0x10] sm:$0xff]  }
   0x2   :  { %1113 = vmatprep.subr.bf16.mxu1 %v1260_v0  ;;  %v1264_v4 = vld [vmem:[%s1625_s0] sm:$0xff]   ;;  %v1407_v5 = vld [vmem:[%s1624_s2 + $0x18] sm:$0xff]   ;;  %v43_v7 = vld [vmem:[%s1626_s1 + $0x10] sm:$0xff] }
   0x3   :  { %1114 = vmatpush3.bf16.msra.mxu1 %v1260_v0  ;;  %1121 = vmatprep.mubr.msk.bf16.mxu1 %vm101_vm0, %v1264_v4  ;;  %v41_v6 = vld [vmem:[%s1626_s1] sm:$0xff]  ;;  %v42_v8 = vld [vmem:[%s1626_s1 + $0x8] sm:$0xff]  ;;  %v44_v9 = vld [vmem:[%s1626_s1 + $0x18] sm:$0xff] }
   0x4   :  { %1115 = vmatprep.subr.bf16.mxu1 %v1389_v2  ;;  %1185 = vmatprep.mubr.msk.bf16.mxu0 %vm101_vm0, %v1264_v4  ;;  %v1426_v10 = vld [vmem:[%s1625_s0 + $0x8] sm:$0xff]   ;;  %v1268_v11 = vld [vmem:[%s1627_s4] sm:$0xff]   ;;  %v1441_v14 = vld [vmem:[%s1625_s0 + $0x10] sm:$0xff]  }
   0x5   :  { %181 = vperm.xlu0 %1258, %v41_v6   ;;  %191 = vperm.xlu1 %1259, %v43_v7   ;;  %v45_v12 = vld [vmem:[%s1626_s1 + $0x20] sm:$0xff]  ;;  %v46_v13 = vld [vmem:[%s1626_s1 + $0x28] sm:$0xff]  ;;  %v47_v16 = vld [vmem:[%s1626_s1 + $0x30] sm:$0xff] }
   0x6   :  { %v1269_v15 = vld [vmem:[%s1627_s4 + $0x8] sm:$0xff]   ;;  %v48_v17 = vld [vmem:[%s1626_s1 + $0x38] sm:$0xff]  ;;  %v1270_v18 = vld [vmem:[%s1627_s4 + $0x10] sm:$0xff]  }
   0x7   :  { %1116 = vmatpush3.bf16.msra.mxu1 %v1389_v2  ;;  %v1462_v19 = vld [vmem:[%s1625_s0 + $0x18] sm:$0xff]   ;;  %v1272_v21 = vld [vmem:[%s1627_s4 + $0x20] sm:$0xff]   ;;  %v1273_v22 = vld [vmem:[%s1627_s4 + $0x28] sm:$0xff]  }
   0x8   :  { %1117 = vmatprep.subr.bf16.mxu1 %v1394_v3  ;;  %v1271_v20 = vld [vmem:[%s1627_s4 + $0x18] sm:$0xff]   ;;  %v1274_v23 = vld [vmem:[%s1627_s4 + $0x30] sm:$0xff]   ;;  %v1276_v25 = vld [vmem:[%s1628_s3] sm:$0xff]  }
   0x9   :  { %186 = vperm.xlu0 %1258, %v42_v8   ;;  %196 = vperm.xlu1 %1259, %v44_v9   ;;  %v1275_v24 = vld [vmem:[%s1627_s4 + $0x38] sm:$0xff]   ;;  %v1277_v26 = vld [vmem:[%s1628_s3 + $0x8] sm:$0xff]   ;;  %v1278_v27 = vld [vmem:[%s1628_s3 + $0x10] sm:$0xff]  }
   0xa   :  { %v1279_v28 = vld [vmem:[%s1628_s3 + $0x18] sm:$0xff]   ;;  %v1280_v29 = vld [vmem:[%s1628_s3 + $0x20] sm:$0xff]   ;;  %v1281_v30 = vld [vmem:[%s1628_s3 + $0x28] sm:$0xff]  }
   0xb   :  { %1118 = vmatpush3.bf16.msra.mxu1 %v1394_v3  ;;  %v1282_v31 = vld [vmem:[%s1628_s3 + $0x30] sm:$0xff]   ;;  %v1283_v32 = vld [vmem:[%s1628_s3 + $0x38] sm:$0xff]   ;;  %v1027_v61 = vld [vmem:[%s1629_s5] ss:$0 sm:$0xff] }
   0xc   :  { %1119 = vmatprep.subr.bf16.mxu1 %v1407_v5 }
   0xd   :  { %201 = vperm.xlu0 %1258, %v45_v12   ;;  %206 = vperm.xlu1 %1259, %v46_v13  }
   0xf   :  { %1120 = vmatpush3.bf16.msra.mxu1 %v1407_v5 }
  0x10   :  { %1129 = vmatprep.subr.bf16.mxu1 %v1268_v11 }
  0x11   :  { %211 = vperm.xlu0 %1258, %v47_v16   ;;  %216 = vperm.xlu1 %1259, %v48_v17  }
  0x12   :  { %1122 = vmatmul.mubr.msk.bf16.vlgmr.msra.gmra.mrb[0].mxu1 %vm101_vm0, %v1426_v10 }
  0x13   :  { %1125 = vmatprep.mubr.msk.bf16.mxu1 %vm101_vm0, %v1441_v14  ;;  %1130 = vmatpush3.bf16.msra.mxu1 %v1268_v11 }
  0x14   :  { %1131 = vmatprep.subr.bf16.mxu1 %v1269_v15 }
  0x17   :  { %1132 = vmatpush3.bf16.msra.mxu1 %v1269_v15 }
  0x18   :  { %1133 = vmatprep.subr.bf16.mxu1 %v1270_v18 }
  0x1a   :  { %1126 = vmatmul.mubr.msk.bf16.gmra.mrb[4].mxu1 %vm101_vm0, %v1462_v19 }
  0x1b   :  { %1134 = vmatpush3.bf16.msra.mxu1 %v1270_v18  ;;  %1145 = vmatprep.mubr.bf16.mxu1 %v1260_v0 }
  0x1c   :  { %1135 = vmatprep.subr.bf16.mxu1 %v1271_v20 }
  0x1f   :  { %1136 = vmatpush3.bf16.msra.mxu1 %v1271_v20 }
  0x20   :  { %1137 = vmatprep.subr.bf16.mxu1 %v1272_v21 }
  0x23   :  { %1138 = vmatpush3.bf16.msra.mxu1 %v1272_v21 }
  0x24   :  { %1139 = vmatprep.subr.bf16.mxu1 %v1273_v22 }
  0x27   :  { %1140 = vmatpush3.bf16.msra.mxu1 %v1273_v22 }
  0x28   :  { %1141 = vmatprep.subr.bf16.mxu1 %v1274_v23 }
  0x2b   :  { %1142 = vmatpush3.bf16.msra.mxu1 %v1274_v23 }
  0x2c   :  { %1143 = vmatprep.subr.bf16.mxu1 %v1275_v24 }
  0x2f   :  { %1144 = vmatpush3.bf16.msra.mxu1 %v1275_v24 }
  0x30   :  { %1153 = vmatprep.subr.bf16.mxu1 %v1276_v25 }
  0x32   :  { %1146 = vmatmul.mubr.bf16.vlgmr.msra.gmra.mrb[8].mxu1 %v1389_v2 }
  0x33   :  { %1154 = vmatpush3.bf16.msra.mxu1 %v1276_v25  ;;  %1149 = vmatprep.mubr.bf16.mxu1 %v1394_v3 }
  0x34   :  { %1155 = vmatprep.subr.bf16.mxu1 %v1277_v26 }
  0x37   :  { %1156 = vmatpush3.bf16.msra.mxu1 %v1277_v26 }
  0x38   :  { %1157 = vmatprep.subr.bf16.mxu1 %v1278_v27 }
  0x3a   :  { %1150 = vmatmul.mubr.bf16.gmra.mrb[12].mxu1 %v1407_v5 }
  0x3b   :  { %1158 = vmatpush3.bf16.msra.mxu1 %v1278_v27 }
  0x3c   :  { %1159 = vmatprep.subr.bf16.mxu1 %v1279_v28 }
  0x3f   :  { %1160 = vmatpush3.bf16.msra.mxu1 %v1279_v28 }
  0x40   :  { %1161 = vmatprep.subr.bf16.mxu1 %v1280_v29 }
  0x43   :  { %1162 = vmatpush3.bf16.msra.mxu1 %v1280_v29 }
  0x44   :  { %1163 = vmatprep.subr.bf16.mxu1 %v1281_v30 }
  0x47   :  { %1164 = vmatpush3.bf16.msra.mxu1 %v1281_v30 }
  0x48   :  { %1165 = vmatprep.subr.bf16.mxu1 %v1282_v31 }
  0x4b   :  { %1166 = vmatpush3.bf16.msra.mxu1 %v1282_v31 }
  0x4c   :  { %1167 = vmatprep.subr.bf16.mxu1 %v1283_v32 }
  0x4f   :  { %1168 = vmatpush3.bf16.msra.mxu1 %v1283_v32 }
  0x84   :  { %v1508_v33 = vpop.permute.xlu0 %181  ;;  %v1510_v34 = vpop.permute.xlu1 %191 }
  0x88   :  { %v1512_v35 = vpop.permute.xlu0 %186  ;;  %v1514_v36 = vpop.permute.xlu1 %196 }
  0x8c   :  { %v1516_v40 = vpop.permute.xlu0 %201  ;;  %v1520_v44 = vpop.permute.xlu1 %206 }
  0x90   :  { %v1524_v50 = vpop.permute.xlu0 %211  ;;  %v1526_v52 = vpop.permute.xlu1 %216 }
  0xe5   :  { %v1123_v37 = vpop.f32.mrb[0].mxu1 }
  0xe6   :  { %v148_v38 = vpop.f32.mrb[1].mxu1  ;;  %v221_v41 = vmul.f32 %v1123_v37, %v1510_v34 }
  0xe7   :  { %v1124_v39 = vpop.f32.mrb[2].mxu1  ;;  %v219_v45 = vmul.f32 %v1508_v33, %v148_v38 }
  0xe8   :  { %v222_v42 = vmul.f32 %v1124_v39, %v1514_v36  ;;  %v151_v43 = vpop.f32.mrb[3].mxu1 }
  0xe9   :  { %v220_v46 = vmul.f32 %v1512_v35, %v151_v43 }
  0xea   :  { %v228_v47 = vpack.c.bf16 %v222_v42, %v221_v41 }
  0xeb   :  { %v227_v48 = vpack.c.bf16 %v220_v46, %v219_v45 }
  0xed   :  { %v1127_v49 = vpop.f32.mrb[4].mxu1  ;;  %1169 = vmatprep.mubr.bf16.mxu1 %v227_v48 }
  0xee   :  { %v164_v51 = vpop.f32.mrb[5].mxu1  ;;  %1170 = vmatmul.mubr.bf16.vlgmr.msra.gmra.mrb[8].mxu1 %v228_v47  ;;  %v225_v54 = vmul.f32 %v1127_v49, %v1524_v50 }
  0xef   :  { %v1128_v53 = vpop.f32.mrb[6].mxu1  ;;  %v223_v57 = vmul.f32 %v1516_v40, %v164_v51 }
  0xf0   :  { %v226_v55 = vmul.f32 %v1128_v53, %v1526_v52  ;;  %v167_v56 = vpop.f32.mrb[7].mxu1 }
  0xf1   :  { %v224_v58 = vmul.f32 %v1520_v44, %v167_v56 }
  0xf2   :  { %v230_v59 = vpack.c.bf16 %v226_v55, %v225_v54 }
  0xf3   :  { %v229_v60 = vpack.c.bf16 %v224_v58, %v223_v57 }
  0xf5   :  { %1173 = vmatprep.mubr.bf16.mxu1 %v229_v60 }
  0xf6   :  { %1174 = vmatmul.mubr.bf16.gmra.mrb[12].mxu1 %v230_v59 }
 0x1c1   :  { %v1171_v62 = vpop.f32.mrb[8].mxu1 }
 0x1c2   :  { %v458_v63 = vpop.f32.mrb[9].mxu1  ;;  %v498_v3 = vadd.f32 %v1171_v62, %v1027_v61 }
 0x1c3   :  { %v496_v0 = vadd.f32 %v1027_v61, %v458_v63  ;;  %v1172_v1 = vpop.f32.mrb[10].mxu1 }
 0x1c4   :  { %v461_v2 = vpop.f32.mrb[11].mxu1  ;;  %v499_v7 = vadd.f32 %v1172_v1, %v1027_v61  ;;  %v506_v9 = vmul.f32 %v498_v3, %v498_v3 }
 0x1c5   :  { %v497_v4 = vadd.f32 %v1027_v61, %v461_v2  ;;  %v504_v5 = vmul.f32 %v496_v0, %v496_v0 }
 0x1c6   :  { %v507_v18 = vmul.f32 %v499_v7, %v499_v7 }
 0x1c7   :  { %512 = vadd.xlane.f32.xlu0 %v504_v5  ;;  %v505_v6 = vmul.f32 %v497_v4, %v497_v4 }
 0x1c9   :  { %514 = vadd.xlane.f32.xlu1 %v505_v6  ;;  %v1175_v8 = vpop.f32.mrb[12].mxu1 }
 0x1ca   :  { %v474_v11 = vpop.f32.mrb[13].mxu1  ;;  %v502_v16 = vadd.f32 %v1175_v8, %v1027_v61 }
 0x1cb   :  { %v500_v12 = vadd.f32 %v1027_v61, %v474_v11  ;;  %516 = vadd.xlane.f32.xlu0 %v506_v9  ;;  %v1176_v13 = vpop.f32.mrb[14].mxu1 }
 0x1cc   :  { %v477_v15 = vpop.f32.mrb[15].mxu1  ;;  %v503_v21 = vadd.f32 %v1176_v13, %v1027_v61  ;;  %v510_v22 = vmul.f32 %v502_v16, %v502_v16 }
 0x1cd   :  { %v501_v17 = vadd.f32 %v1027_v61, %v477_v15  ;;  %v508_v20 = vmul.f32 %v500_v12, %v500_v12 }
 0x1ce   :  { %v511_v24 = vmul.f32 %v503_v21, %v503_v21 }
 0x1cf   :  { %518 = vadd.xlane.f32.xlu0 %v507_v18  ;;  %520 = vadd.xlane.f32.xlu1 %v508_v20  ;;  %v509_v23 = vmul.f32 %v501_v17, %v501_v17  ;;  %v1287_v18 = vld [vmem:[%s1630_s7 + $0x18] sm:$0xff]   ;;  %v1290_v20 = vld [vmem:[%s1630_s7 + $0x30] sm:$0xff]  }
 0x1d3   :  { %524 = vadd.xlane.f32.xlu1 %v510_v22  ;;  %522 = vadd.xlane.f32.xlu0 %v509_v23  ;;  %v1293_v22 = vld [vmem:[%s1631_s6 + $0x8] sm:$0xff]   ;;  %v1294_v23 = vld [vmem:[%s1631_s6 + $0x10] sm:$0xff]  }
 0x1d7   :  { %526 = vadd.xlane.f32.xlu0 %v511_v24  ;;  %v1295_v24 = vld [vmem:[%s1631_s6 + $0x18] sm:$0xff]  }
 0x254   :  { %v513_v25 = vpop.xlane.xlu0 %512 }
 0x255   :  { %v528_v26 = vmax.f32 %v513_v25, 1e-24  ;;  %v1296_v25 = vld [vmem:[%s1631_s6 + $0x20] sm:$0xff]  }
 0x256   :  { %v515_v27 = vpop.xlane.xlu1 %514 }
 0x257   :  { %1300 = vrsqrt.f32 %v528_v26  ;;  %v529_v28 = vmax.f32 %v515_v27, 1e-24  ;;  %v1297_v26 = vld [vmem:[%s1631_s6 + $0x28] sm:$0xff]   ;;  %v1298_v27 = vld [vmem:[%s1631_s6 + $0x30] sm:$0xff]  }
 0x258   :  { %v517_v29 = vpop.xlane.xlu0 %516 }
 0x259   :  { %1302 = vrsqrt.f32 %v529_v28  ;;  %v530_v30 = vmax.f32 %v517_v29, 1e-24  ;;  %v1299_v28 = vld [vmem:[%s1631_s6 + $0x38] sm:$0xff]  }
 0x25b   :  { %1304 = vrsqrt.f32 %v530_v30 }
 0x25c   :  { %v519_v31 = vpop.xlane.xlu0 %518  ;;  %v521_v32 = vpop.xlane.xlu1 %520 }
 0x25d   :  { %v531_v37 = vmax.f32 %v519_v31, 1e-24  ;;  %v532_v38 = vmax.f32 %v521_v32, 1e-24 }
 0x25f   :  { %1306 = vrsqrt.f32 %v531_v37 }
 0x260   :  { %1308 = vrsqrt.f32 %v532_v38  ;;  %v525_v39 = vpop.xlane.xlu1 %524  ;;  %v523_v41 = vpop.xlane.xlu0 %522 }
 0x261   :  { %v1301_v42 = vpop.eup %1300  ;;  %v534_v43 = vmax.f32 %v525_v39, 1e-24  ;;  %v533_v45 = vmax.f32 %v523_v41, 1e-24 }
 0x262   :  { %v544_v46 = vmul.f32 %v1301_v42, %v496_v0 }
 0x263   :  { %v1303_v47 = vpop.eup %1302  ;;  %1310 = vrsqrt.f32 %v534_v43 }
 0x264   :  { %1312 = vrsqrt.f32 %v533_v45  ;;  %v527_v48 = vpop.xlane.xlu0 %526  ;;  %v545_v49 = vmul.f32 %v1303_v47, %v497_v4  ;;  %v552_v54 = vmax.f32 %v544_v46, 0.0 }
 0x265   :  { %v1305_v51 = vpop.eup %1304  ;;  %v535_v53 = vmax.f32 %v527_v48, 1e-24 }
 0x266   :  { %v553_v55 = vmax.f32 %v545_v49, 0.0  ;;  %v546_v57 = vmul.f32 %v1305_v51, %v498_v3 }
 0x267   :  { %1314 = vrsqrt.f32 %v535_v53 }
 0x268   :  { %v585_v56 = vpack.c.bf16 %v553_v55, %v552_v54  ;;  %v554_v61 = vmax.f32 %v546_v57, 0.0 }
 0x269   :  { %v1307_v58 = vpop.eup %1306 }
 0x26a   :  { %v1309_v59 = vpop.eup %1308  ;;  %1177 = vmatprep.subr.bf16.mxu0 %v585_v56  ;;  %v547_v60 = vmul.f32 %v1307_v58, %v499_v7 }
 0x26b   :  { %1178 = vmatpush3.bf16.msra.mxu0 %v585_v56  ;;  %v548_v0 = vmul.f32 %v1309_v59, %v500_v12  ;;  %v1284_v12 = vld [vmem:[%s1630_s7] sm:$0xff]  }
 0x26c   :  { %v555_v62 = vmax.f32 %v547_v60, 0.0 }
 0x26d   :  { %v1311_v63 = vpop.eup %1310  ;;  %v556_v8 = vmax.f32 %v548_v0, 0.0 }
 0x26e   :  { %v1313_v1 = vpop.eup %1312  ;;  %v586_v2 = vpack.c.bf16 %v555_v62, %v554_v61  ;;  %v550_v4 = vmul.f32 %v1311_v63, %v502_v16  ;;  %v1285_v16 = vld [vmem:[%s1630_s7 + $0x8] sm:$0xff]  }
 0x26f   :  { %v549_v5 = vmul.f32 %v1313_v1, %v501_v17  ;;  %v1286_v17 = vld [vmem:[%s1630_s7 + $0x10] sm:$0xff]  }
 0x270   :  { %1179 = vmatprep.subr.bf16.mxu0 %v586_v2  ;;  %v558_v13 = vmax.f32 %v550_v4, 0.0 }
 0x271   :  { %v1315_v6 = vpop.eup %1314  ;;  %1180 = vmatpush3.bf16.msra.mxu0 %v586_v2  ;;  %v557_v9 = vmax.f32 %v549_v5, 0.0 }
 0x272   :  { %v551_v11 = vmul.f32 %v1315_v6, %v503_v21  ;;  %v1292_v21 = vld [vmem:[%s1631_s6] sm:$0xff]  }
 0x273   :  { %v587_v3 = vpack.c.bf16 %v557_v9, %v556_v8 }
 0x274   :  { %v559_v15 = vmax.f32 %v551_v11, 0.0 }
 0x275   :  { %1181 = vmatprep.subr.bf16.mxu0 %v587_v3 }
 0x276   :  { %1182 = vmatpush3.bf16.msra.mxu0 %v587_v3  ;;  %v588_v7 = vpack.c.bf16 %v559_v15, %v558_v13 }
 0x278   :  { %1183 = vmatprep.subr.bf16.mxu0 %v588_v7 }
 0x27a   :  { %1184 = vmatpush3.bf16.msra.mxu0 %v588_v7 }
 0x27b   :  { %1193 = vmatprep.subr.bf16.mxu0 %v1284_v12 }
 0x27d   :  { %1186 = vmatmul.mubr.msk.bf16.vlgmr.msra.gmra.mrb[0].mxu0 %vm101_vm0, %v1426_v10  ;;  %v1288_v10 = vld [vmem:[%s1630_s7 + $0x20] sm:$0xff]  }
 0x27e   :  { %1194 = vmatpush3.bf16.msra.mxu0 %v1284_v12  ;;  %1189 = vmatprep.mubr.msk.bf16.mxu0 %vm101_vm0, %v1441_v14  ;;  %v1289_v14 = vld [vmem:[%s1630_s7 + $0x28] sm:$0xff]  }
 0x27f   :  { %1195 = vmatprep.subr.bf16.mxu0 %v1285_v16 }
 0x282   :  { %1196 = vmatpush3.bf16.msra.mxu0 %v1285_v16 }
 0x283   :  { %1197 = vmatprep.subr.bf16.mxu0 %v1286_v17 }
 0x285   :  { %1190 = vmatmul.mubr.msk.bf16.gmra.mrb[4].mxu0 %vm101_vm0, %v1462_v19  ;;  %v1291_v19 = vld [vmem:[%s1630_s7 + $0x38] sm:$0xff]  }
 0x286   :  { %1198 = vmatpush3.bf16.msra.mxu0 %v1286_v17  ;;  %1209 = vmatprep.mubr.bf16.mxu0 %v585_v56 }
 0x287   :  { %1199 = vmatprep.subr.bf16.mxu0 %v1287_v18 }
 0x28a   :  { %1200 = vmatpush3.bf16.msra.mxu0 %v1287_v18 }
 0x28b   :  { %1201 = vmatprep.subr.bf16.mxu0 %v1288_v10 }
 0x28e   :  { %1202 = vmatpush3.bf16.msra.mxu0 %v1288_v10 }
 0x28f   :  { %1203 = vmatprep.subr.bf16.mxu0 %v1289_v14 }
 0x292   :  { %1204 = vmatpush3.bf16.msra.mxu0 %v1289_v14 }
 0x293   :  { %1205 = vmatprep.subr.bf16.mxu0 %v1290_v20 }
 0x296   :  { %1206 = vmatpush3.bf16.msra.mxu0 %v1290_v20 }
 0x297   :  { %1207 = vmatprep.subr.bf16.mxu0 %v1291_v19 }
 0x29a   :  { %1208 = vmatpush3.bf16.msra.mxu0 %v1291_v19 }
 0x29b   :  { %1217 = vmatprep.subr.bf16.mxu0 %v1292_v21 }
 0x29d   :  { %1210 = vmatmul.mubr.bf16.vlgmr.msra.gmra.mrb[8].mxu0 %v586_v2 }
 0x29e   :  { %1213 = vmatprep.mubr.bf16.mxu0 %v587_v3  ;;  %1218 = vmatpush3.bf16.msra.mxu0 %v1292_v21 }
 0x29f   :  { %1219 = vmatprep.subr.bf16.mxu0 %v1293_v22 }
 0x2a2   :  { %1220 = vmatpush3.bf16.msra.mxu0 %v1293_v22 }
 0x2a3   :  { %1221 = vmatprep.subr.bf16.mxu0 %v1294_v23 }
 0x2a5   :  { %1214 = vmatmul.mubr.bf16.gmra.mrb[12].mxu0 %v588_v7 }
 0x2a6   :  { %1222 = vmatpush3.bf16.msra.mxu0 %v1294_v23 }
 0x2a7   :  { %1223 = vmatprep.subr.bf16.mxu0 %v1295_v24 }
 0x2aa   :  { %1224 = vmatpush3.bf16.msra.mxu0 %v1295_v24 }
 0x2ab   :  { %1225 = vmatprep.subr.bf16.mxu0 %v1296_v25 }
 0x2ae   :  { %1226 = vmatpush3.bf16.msra.mxu0 %v1296_v25 }
 0x2af   :  { %1227 = vmatprep.subr.bf16.mxu0 %v1297_v26 }
 0x2b2   :  { %1228 = vmatpush3.bf16.msra.mxu0 %v1297_v26 }
 0x2b3   :  { %1229 = vmatprep.subr.bf16.mxu0 %v1298_v27 }
 0x2b6   :  { %1230 = vmatpush3.bf16.msra.mxu0 %v1298_v27 }
 0x2b7   :  { %1231 = vmatprep.subr.bf16.mxu0 %v1299_v28 }
 0x2ba   :  { %1232 = vmatpush3.bf16.msra.mxu0 %v1299_v28 }
 0x350   :  { %v1187_v29 = vpop.f32.mrb[0].mxu0 }
 0x351   :  { %v623_v30 = vpop.f32.mrb[1].mxu0  ;;  %v656_v32 = vmul.f32 %v1187_v29, %v1510_v34 }
 0x352   :  { %v1188_v31 = vpop.f32.mrb[2].mxu0  ;;  %v654_v39 = vmul.f32 %v623_v30, %v1508_v33 }
 0x353   :  { %v657_v37 = vmul.f32 %v1188_v31, %v1514_v36  ;;  %v626_v38 = vpop.f32.mrb[3].mxu0 }
 0x354   :  { %v655_v41 = vmul.f32 %v626_v38, %v1512_v35  ;;  %v1048_v35 = vld [vmem:[%s1632_s8] ss:$0 sm:$0xff] }
 0x355   :  { %v663_v42 = vpack.c.bf16 %v657_v37, %v656_v32 }
 0x356   :  { %v662_v43 = vpack.c.bf16 %v655_v41, %v654_v39 }
 0x358   :  { %v1191_v45 = vpop.f32.mrb[4].mxu0  ;;  %1233 = vmatprep.mubr.bf16.mxu0 %v662_v43 }
 0x359   :  { %v639_v46 = vpop.f32.mrb[5].mxu0  ;;  %1234 = vmatmul.mubr.bf16.vlgmr.msra.gmra.mrb[8].mxu0 %v663_v42  ;;  %v660_v48 = vmul.f32 %v1191_v45, %v1524_v50 }
 0x35a   :  { %v1192_v47 = vpop.f32.mrb[6].mxu0  ;;  %v658_v34 = vmul.f32 %v639_v46, %v1516_v40 }
 0x35b   :  { %v661_v49 = vmul.f32 %v1192_v47, %v1526_v52  ;;  %v642_v51 = vpop.f32.mrb[7].mxu0 }
 0x35c   :  { %v659_v36 = vmul.f32 %v642_v51, %v1520_v44 }
 0x35d   :  { %v665_v53 = vpack.c.bf16 %v661_v49, %v660_v48 }
 0x35e   :  { %v664_v33 = vpack.c.bf16 %v659_v36, %v658_v34 }
 0x360   :  { %1237 = vmatprep.mubr.bf16.mxu0 %v664_v33 }
 0x361   :  { %1238 = vmatmul.mubr.bf16.gmra.mrb[12].mxu0 %v665_v53 }
 0x42c   :  { %v1235_v54 = vpop.f32.mrb[8].mxu0 }
 0x42d   :  { %v933_v55 = vadd.f32 %v1235_v54, %v1048_v35  ;;  %v893_v56 = vpop.f32.mrb[9].mxu0 }
 0x42e   :  { %v1236_v57 = vpop.f32.mrb[10].mxu0  ;;  %v931_v50 = vadd.f32 %v1048_v35, %v893_v56 }
 0x42f   :  { %v934_v58 = vadd.f32 %v1236_v57, %v1048_v35  ;;  %v896_v52 = vpop.f32.mrb[11].mxu0  ;;  %v941_v59 = vmul.f32 %v933_v55, %v933_v55 }
 0x430   :  { %v932_v60 = vadd.f32 %v1048_v35, %v896_v52  ;;  %v939_v44 = vmul.f32 %v931_v50, %v931_v50 }
 0x431   :  { %951 = vadd.xlane.f32.xlu1 %v941_v59  ;;  %v942_v40 = vmul.f32 %v934_v58, %v934_v58 }
 0x432   :  { %v940_v63 = vmul.f32 %v932_v60, %v932_v60 }
 0x433   :  { %953 = vadd.xlane.f32.xlu0 %v942_v40 }
 0x434   :  { %v1239_v61 = vpop.f32.mrb[12].mxu0 }
 0x435   :  { %947 = vadd.xlane.f32.xlu1 %v939_v44  ;;  %v909_v62 = vpop.f32.mrb[13].mxu0  ;;  %v937_v5 = vadd.f32 %v1239_v61, %v1048_v35 }
 0x436   :  { %v935_v0 = vadd.f32 %v1048_v35, %v909_v62  ;;  %v1240_v1 = vpop.f32.mrb[14].mxu0 }
 0x437   :  { %949 = vadd.xlane.f32.xlu0 %v940_v63  ;;  %v912_v2 = vpop.f32.mrb[15].mxu0  ;;  %v938_v8 = vadd.f32 %v1240_v1, %v1048_v35  ;;  %v945_v11 = vmul.f32 %v937_v5, %v937_v5 }
 0x438   :  { %v936_v4 = vadd.f32 %v1048_v35, %v912_v2  ;;  %v943_v6 = vmul.f32 %v935_v0, %v935_v0 }
 0x439   :  { %v946_v3 = vmul.f32 %v938_v8, %v938_v8 }
 0x43a   :  { %955 = vadd.xlane.f32.xlu1 %v943_v6  ;;  %v944_v9 = vmul.f32 %v936_v4, %v936_v4 }
 0x43c   :  { %957 = vadd.xlane.f32.xlu0 %v944_v9 }
 0x43e   :  { %959 = vadd.xlane.f32.xlu1 %v945_v11 }
 0x440   :  { %961 = vadd.xlane.f32.xlu0 %v946_v3 }
 0x4be   :  { %v952_v13 = vpop.xlane.xlu1 %951 }
 0x4bf   :  { %v965_v15 = vmax.f32 %v952_v13, 1e-24 }
 0x4c0   :  { %v954_v7 = vpop.xlane.xlu0 %953 }
 0x4c1   :  { %1316 = vrsqrt.f32 %v965_v15  ;;  %v966_v12 = vmax.f32 %v954_v7, 1e-24 }
 0x4c2   :  { %v948_v16 = vpop.xlane.xlu1 %947 }
 0x4c3   :  { %1318 = vrsqrt.f32 %v966_v12  ;;  %v963_v17 = vmax.f32 %v948_v16, 1e-24 }
 0x4c4   :  { %v950_v18 = vpop.xlane.xlu0 %949 }
 0x4c5   :  { %1320 = vrsqrt.f32 %v963_v17  ;;  %v964_v10 = vmax.f32 %v950_v18, 1e-24 }
 0x4c7   :  { %1322 = vrsqrt.f32 %v964_v10  ;;  %v956_v14 = vpop.xlane.xlu1 %955 }
 0x4c8   :  { %v967_v20 = vmax.f32 %v956_v14, 1e-24 }
 0x4c9   :  { %v958_v19 = vpop.xlane.xlu0 %957 }
 0x4ca   :  { %1324 = vrsqrt.f32 %v967_v20  ;;  %v968_v21 = vmax.f32 %v958_v19, 1e-24 }
 0x4cb   :  { %v1317_v22 = vpop.eup %1316  ;;  %v960_v23 = vpop.xlane.xlu1 %959 }
 0x4cc   :  { %v981_v24 = vmul.f32 %v1317_v22, %v933_v55  ;;  %1326 = vrsqrt.f32 %v968_v21  ;;  %v969_v25 = vmax.f32 %v960_v23, 1e-24 }
 0x4cd   :  { %v1319_v26 = vpop.eup %1318  ;;  %v962_v27 = vpop.xlane.xlu0 %961 }
 0x4ce   :  { %989 = vst [vmem:[%s1633_s9 + $0x10] sm:$0xff] %v981_v24  ;;  %v982_v28 = vmul.f32 %v1319_v26, %v934_v58  ;;  %1328 = vrsqrt.f32 %v969_v25  ;;  %v970_v29 = vmax.f32 %v962_v27, 1e-24 }
 0x4cf   :  { %v1321_v30 = vpop.eup %1320 }
 0x4d0   :  { %990 = vst [vmem:[%s1633_s9 + $0x18] sm:$0xff] %v982_v28  ;;  %v979_v31 = vmul.f32 %v1321_v30, %v931_v50  ;;  %1330 = vrsqrt.f32 %v970_v29 }
 0x4d1   :  { %v1323_v32 = vpop.eup %1322 }
 0x4d2   :  { %987 = vst [vmem:[%s1633_s9] sm:$0xff] %v979_v31  ;;  %v980_v37 = vmul.f32 %v1323_v32, %v932_v60 }
 0x4d4   :  { %v1325_v38 = vpop.eup %1324  ;;  %988 = vst [vmem:[%s1633_s9 + $0x8] sm:$0xff] %v980_v37 }
 0x4d5   :  { %v983_v39 = vmul.f32 %v1325_v38, %v935_v0 }
 0x4d6   :  { %v1327_v41 = vpop.eup %1326 }
 0x4d7   :  { %991 = vst [vmem:[%s1633_s9 + $0x20] sm:$0xff] %v983_v39  ;;  %v984_v42 = vmul.f32 %v1327_v41, %v936_v4 }
 0x4d8   :  { %v1329_v43 = vpop.eup %1328 }
 0x4d9   :  { %992 = vst [vmem:[%s1633_s9 + $0x28] sm:$0xff] %v984_v42  ;;  %v985_v45 = vmul.f32 %v1329_v43, %v937_v5 }
 0x4da   :  { %v1331_v46 = vpop.eup %1330 }
 0x4db   :  { %993 = vst [vmem:[%s1633_s9 + $0x30] sm:$0xff] %v985_v45  ;;  %v986_v47 = vmul.f32 %v1331_v46, %v938_v8 }
 0x4dd   :  { %994 = vst [vmem:[%s1633_s9 + $0x38] sm:$0xff] %v986_v47 }

</bundles_post_ra>
